<compile_context>
chip_gen: v6e
topology: v6e:2x2x1
jax: 0.10.0
libtpu: 0.0.40
codegen_flags: <defaults>
</compile_context>

<pallas_src>
import functools

import jax
import jax.numpy as jnp
from jax.experimental import pallas as pl
from jax.experimental.pallas import tpu as pltpu


def dnn_kernel(x_ref, w1_ref, b1_ref, w2_ref, b2_ref, o_ref, *, out_dim):
    # x:  (TB, D_in)          f32 (cast to matmul dtype in-kernel)
    # w1: (D_in, D_mid_p)     compute dtype (f32 or bf16)
    # b1: (1, D_mid_p)        f32
    # w2: (D_mid_p, D_out_p)  compute dtype
    # b2: (1, D_out_p)        f32
    # o:  (TB, D_out_p)       f32
    x = x_ref[...].astype(w1_ref.dtype)

    # fc1 on the MXU with f32 accumulation; bias-add + leaky_relu(0.1) in f32 on the VPU.
    h = jnp.dot(x, w1_ref[...], preferred_element_type=jnp.float32)
    h = h + b1_ref[...]
    h = jnp.where(h > 0, h, 0.1 * h)

    # fc2 (cast activations back to the matmul dtype; no-op for f32).
    z = jnp.dot(h.astype(w2_ref.dtype), w2_ref[...],
                preferred_element_type=jnp.float32)
    z = z + b2_ref[...]

    # Mask padded logit columns so log_softmax over the padded 128-wide block equals
    # log_softmax over the real `out_dim` classes.
    col = jax.lax.broadcasted_iota(jnp.int32, z.shape, 1)
    z = jnp.where(col < out_dim, z, jnp.float32(-1e30))

    # Numerically stable log_softmax over dim=1.
    m = jnp.max(z, axis=-1, keepdims=True)
    s = z - m
    lse = jnp.log(jnp.sum(jnp.exp(s), axis=-1, keepdims=True))
    o_ref[...] = (s - lse).astype(o_ref.dtype)


def _round_up(x, m):
    return pl.cdiv(x, m) * m


def prepare_params(w1, b1, w2, b2, compute_dtype=jnp.float32):
    """One-time weight prep (do NOT call per forward).

    PyTorch Linear convention in:  w1 (mid, in), b1 (mid,), w2 (out, mid), b2 (out,).
    Out: transposed, zero-padded to lane-aligned widths, weights cast to compute_dtype,
    biases kept f32 (bias-add happens in f32 inside the kernel)."""
    mid_dim, in_dim = w1.shape
    out_dim = w2.shape[0]
    mid_p = _round_up(mid_dim, 128)
    out_p = _round_up(out_dim, 128)

    w1_t = jnp.zeros((in_dim, mid_p), compute_dtype).at[:, :mid_dim].set(
        jnp.transpose(w1).astype(compute_dtype))
    b1_p = jnp.zeros((1, mid_p), jnp.float32).at[0, :mid_dim].set(
        b1.astype(jnp.float32))
    w2_t = jnp.zeros((mid_p, out_p), compute_dtype).at[:mid_dim, :out_dim].set(
        jnp.transpose(w2).astype(compute_dtype))
    b2_p = jnp.zeros((1, out_p), jnp.float32).at[0, :out_dim].set(
        b2.astype(jnp.float32))
    return (w1_t, b1_p, w2_t, b2_p), out_dim


def dnn_forward(x_nchw, params, out_dim=10, block_b=512):
    """x_nchw: (B, C, H, W). params: output of prepare_params."""
    w1_t, b1_p, w2_t, b2_p = params
    B = x_nchw.shape[0]
    x2d = x_nchw.reshape(B, -1)                      # torch.flatten(x, 1)
    x2d = x2d.astype(jnp.float32)
    d_in = x2d.shape[1]
    d_out_p = w2_t.shape[1]

    # Pad batch to a sublane multiple and pick the batch tile.
    padded_b = _round_up(B, 8)
    if padded_b <= block_b:
        tb = padded_b
    else:
        tb = block_b
        padded_b = _round_up(B, tb)
    if padded_b != B:
        x2d = jnp.pad(x2d, ((0, padded_b - B), (0, 0)))

    out = pl.pallas_call(
        functools.partial(dnn_kernel, out_dim=out_dim),
        out_shape=jax.ShapeDtypeStruct((padded_b, d_out_p), jnp.float32),
        grid_spec=pltpu.PrefetchScalarGridSpec(
            num_scalar_prefetch=0,
            grid=(padded_b // tb,),
            in_specs=[
                pl.BlockSpec((tb, d_in), lambda i: (i, 0)),      # x tile (pipelined)
                pl.BlockSpec(w1_t.shape, lambda i: (0, 0)),      # weights stay VMEM-resident
                pl.BlockSpec(b1_p.shape, lambda i: (0, 0)),
                pl.BlockSpec(w2_t.shape, lambda i: (0, 0)),
                pl.BlockSpec(b2_p.shape, lambda i: (0, 0)),
            ],
            out_specs=pl.BlockSpec((tb, d_out_p), lambda i: (i, 0)),
        ),
        compiler_params=pltpu.CompilerParams(
            dimension_semantics=("parallel",),   # shard batch tiles across TCs on v7x
        ),
    )(x2d, w1_t, b1_p, w2_t, b2_p)

    return out[:B, :out_dim]


def reference_forward(x_nchw, w1, b1, w2, b2):
    B = x_nchw.shape[0]
    x = x_nchw.reshape(B, -1)
    h = x @ w1.T + b1
    h = jnp.where(h > 0, h, 0.1 * h)
    z = h @ w2.T + b2
    return jax.nn.log_softmax(z, axis=1)


if __name__ == "__main__":
    input_dim, mid_dim, output_dim = 784, 100, 10
    B, C, H, W = 2, 1, 28, 28  # flattens to input_dim = 784

    key = jax.random.PRNGKey(0)
    kx, kw1, kb1, kw2, kb2 = jax.random.split(key, 5)

    x = jax.random.normal(kx, (B, C, H, W), dtype=jnp.float32)
    # Deterministic synthetic parameters (PyTorch Linear shapes).
    w1 = jax.random.normal(kw1, (mid_dim, input_dim), dtype=jnp.float32) * 0.05
    b1 = jax.random.normal(kb1, (mid_dim,), dtype=jnp.float32) * 0.05
    w2 = jax.random.normal(kw2, (output_dim, mid_dim), dtype=jnp.float32) * 0.05
    b2 = jax.random.normal(kb2, (output_dim,), dtype=jnp.float32) * 0.05

    ref = jax.block_until_ready(reference_forward(x, w1, b1, w2, b2))
    fwd = jax.jit(dnn_forward)

    # Exact-semantics f32 path.
    params_f32, od = prepare_params(w1, b1, w2, b2, compute_dtype=jnp.float32)
    out_f32 = jax.block_until_ready(fwd(x, params_f32))
    assert out_f32.shape == (B, output_dim)
    assert jnp.allclose(out_f32, ref, atol=1e-5, rtol=1e-5), "f32 mismatch vs reference"

    # MXU-native bf16 matmuls (f32 accumulation / epilogue) — looser tolerance.
    params_bf16, _ = prepare_params(w1, b1, w2, b2, compute_dtype=jnp.bfloat16)
    out_bf16 = jax.block_until_ready(fwd(x, params_bf16))
    assert out_bf16.shape == (B, output_dim)
    assert jnp.allclose(out_bf16, ref, atol=5e-2, rtol=0), "bf16 mismatch vs reference"

    print("KERNEL_OK")
</pallas_src>

<mosaic_0001>
module attributes {stable_mosaic.version = 11 : i64} {
  func.func @dnn_kernel(%arg0: i32, %arg1: memref<8x784xf32, #tpu.memory_space<vmem>>, %arg2: memref<784x128xf32, #tpu.memory_space<vmem>>, %arg3: memref<1x128xf32, #tpu.memory_space<vmem>>, %arg4: memref<128x128xf32, #tpu.memory_space<vmem>>, %arg5: memref<1x128xf32, #tpu.memory_space<vmem>>, %arg6: memref<8x128xf32, #tpu.memory_space<vmem>>) attributes {dimension_semantics = [#tpu.dimension_semantics<parallel>], iteration_bounds = array<i64: 1>, scalar_prefetch = 0 : i64, scratch_operands = 0 : i64, tpu.core_type = #tpu.core_type<tc>, window_params = [{transform_indices = @transform_0, window_bounds = array<i64: 8, 784>}, {pipeline_mode = #tpu.pipeline_mode<synchronous>, transform_indices = @transform_1, window_bounds = array<i64: 784, 128>}, {pipeline_mode = #tpu.pipeline_mode<synchronous>, transform_indices = @transform_2, window_bounds = array<i64: 1, 128>}, {pipeline_mode = #tpu.pipeline_mode<synchronous>, transform_indices = @transform_3, window_bounds = array<i64: 128, 128>}, {pipeline_mode = #tpu.pipeline_mode<synchronous>, transform_indices = @transform_4, window_bounds = array<i64: 1, 128>}, {transform_indices = @transform_5, window_bounds = array<i64: 8, 128>}]} {
    %c0 = arith.constant 0 : index
    %c0_0 = arith.constant 0 : index
    %0 = vector.load %arg1[%c0, %c0_0] : memref<8x784xf32, #tpu.memory_space<vmem>>, vector<8x784xf32>
    %c0_1 = arith.constant 0 : index
    %c0_2 = arith.constant 0 : index
    %1 = vector.load %arg2[%c0_1, %c0_2] : memref<784x128xf32, #tpu.memory_space<vmem>>, vector<784x128xf32>
    %cst = arith.constant dense<0.000000e+00> : vector<8x128xf32>
    %2 = tpu.matmul %0, %1, %cst {dimension_numbers = #tpu.dot_dimension_numbers<[1], [0], [0], [1], [0, 0, 1, 1], [], []>} : vector<8x784xf32>, vector<784x128xf32>, vector<8x128xf32> -> vector<8x128xf32>
    %c0_3 = arith.constant 0 : index
    %c0_4 = arith.constant 0 : index
    %3 = vector.load %arg3[%c0_3, %c0_4] : memref<1x128xf32, #tpu.memory_space<vmem>>, vector<1x128xf32>
    %4 = vector.broadcast %3 : vector<1x128xf32> to vector<8x128xf32>
    %5 = arith.addf %2, %4 : vector<8x128xf32>
    %cst_5 = arith.constant 0.000000e+00 : f32
    %6 = vector.broadcast %cst_5 : f32 to vector<8x128xf32>
    %7 = arith.cmpf ogt, %5, %6 : vector<8x128xf32>
    %cst_6 = arith.constant 1.000000e-01 : f32
    %8 = vector.broadcast %cst_6 : f32 to vector<8x128xf32>
    %9 = arith.mulf %8, %5 : vector<8x128xf32>
    %10 = arith.select %7, %5, %9 : vector<8x128xi1>, vector<8x128xf32>
    %c0_7 = arith.constant 0 : index
    %c0_8 = arith.constant 0 : index
    %11 = vector.load %arg4[%c0_7, %c0_8] : memref<128x128xf32, #tpu.memory_space<vmem>>, vector<128x128xf32>
    %cst_9 = arith.constant dense<0.000000e+00> : vector<8x128xf32>
    %12 = tpu.matmul %10, %11, %cst_9 {dimension_numbers = #tpu.dot_dimension_numbers<[1], [0], [0], [1], [0, 0, 1, 1], [], []>} : vector<8x128xf32>, vector<128x128xf32>, vector<8x128xf32> -> vector<8x128xf32>
    %c0_10 = arith.constant 0 : index
    %c0_11 = arith.constant 0 : index
    %13 = vector.load %arg5[%c0_10, %c0_11] : memref<1x128xf32, #tpu.memory_space<vmem>>, vector<1x128xf32>
    %14 = vector.broadcast %13 : vector<1x128xf32> to vector<8x128xf32>
    %15 = arith.addf %12, %14 : vector<8x128xf32>
    %16 = tpu.iota {dimensions = array<i32: 1>} : vector<8x128xi32>
    %c10_i32 = arith.constant 10 : i32
    %17 = vector.broadcast %c10_i32 : i32 to vector<8x128xi32>
    %18 = arith.cmpi slt, %16, %17 : vector<8x128xi32>
    %cst_12 = arith.constant -1.000000e+30 : f32
    %19 = vector.broadcast %cst_12 : f32 to vector<8x128xf32>
    %20 = arith.select %18, %15, %19 : vector<8x128xi1>, vector<8x128xf32>
    %cst_13 = arith.constant dense<0xFF800000> : vector<8xf32>
    %21 = vector.multi_reduction <maximumf>, %20, %cst_13 [1] : vector<8x128xf32> to vector<8xf32>
    %22 = vector.shape_cast %21 : vector<8xf32> to vector<8x1xf32>
    %23 = vector.broadcast %22 : vector<8x1xf32> to vector<8x128xf32>
    %24 = arith.subf %20, %23 : vector<8x128xf32>
    %25 = math.exp %24 : vector<8x128xf32>
    %cst_14 = arith.constant dense<0.000000e+00> : vector<8xf32>
    %26 = vector.multi_reduction <add>, %25, %cst_14 [1] : vector<8x128xf32> to vector<8xf32>
    %27 = vector.shape_cast %26 : vector<8xf32> to vector<8x1xf32>
    %28 = math.log %27 : vector<8x1xf32>
    %29 = vector.broadcast %28 : vector<8x1xf32> to vector<8x128xf32>
    %30 = arith.subf %24, %29 : vector<8x128xf32>
    %c0_15 = arith.constant 0 : index
    %c0_16 = arith.constant 0 : index
    %31 = vector.load %arg6[%c0_15, %c0_16] : memref<8x128xf32, #tpu.memory_space<vmem>>, vector<8x128xf32>
    tpu.vector_store %arg6[%c0_15, %c0_16], %30 {strides = array<i32>} : memref<8x128xf32, #tpu.memory_space<vmem>>, vector<8x128xf32>,
    return
  }
  func.func @transform_0(%arg0: i32) -> (i32, i32) {
    %c0_i32 = arith.constant 0 : i32
    %c0_i32_0 = arith.constant 0 : i32
    return %arg0, %c0_i32 : i32, i32
  }
  func.func @transform_1(%arg0: i32) -> (i32, i32) {
    %c0_i32 = arith.constant 0 : i32
    %c0_i32_0 = arith.constant 0 : i32
    %c0_i32_1 = arith.constant 0 : i32
    return %c0_i32, %c0_i32_0 : i32, i32
  }
  func.func @transform_2(%arg0: i32) -> (i32, i32) {
    %c0_i32 = arith.constant 0 : i32
    %c0_i32_0 = arith.constant 0 : i32
    %c0_i32_1 = arith.constant 0 : i32
    return %c0_i32, %c0_i32_0 : i32, i32
  }
  func.func @transform_3(%arg0: i32) -> (i32, i32) {
    %c0_i32 = arith.constant 0 : i32
    %c0_i32_0 = arith.constant 0 : i32
    %c0_i32_1 = arith.constant 0 : i32
    return %c0_i32, %c0_i32_0 : i32, i32
  }
  func.func @transform_4(%arg0: i32) -> (i32, i32) {
    %c0_i32 = arith.constant 0 : i32
    %c0_i32_0 = arith.constant 0 : i32
    %c0_i32_1 = arith.constant 0 : i32
    return %c0_i32, %c0_i32_0 : i32, i32
  }
  func.func @transform_5(%arg0: i32) -> (i32, i32) {
    %c0_i32 = arith.constant 0 : i32
    %c0_i32_0 = arith.constant 0 : i32
    return %arg0, %c0_i32 : i32, i32
  }
}

</mosaic_0001>

<bundles_post_ra>
// kernel: dnn_forward.1
= control target key start
LH: loop header
LB: loop body
LE: loop exit
PB: predicated region body
PF: predicated region fallthrough
CT: control target
= control target key end

     0   :  { %10 = vsyncpa [#allocation3], 0  ;;  %s747_s18 = smov [#allocation2]   ;;  %s883_s0 = inlined_call_operand.vmem [shape: f32[8,784], index: 0, kind: input, shape index: {}]   ;;  %s884_s1 = inlined_call_operand.hbm [shape: f32[784,128], index: 1, kind: input, shape index: {}]   ;;  %s885_s2 = inlined_call_operand.vmem [shape: f32[1,128], index: 2, kind: input, shape index: {}]   ;;  %s886_s3 = inlined_call_operand.vmem [shape: f32[128,128], index: 3, kind: input, shape index: {}]   ;;  %s887_s4 = inlined_call_operand.vmem [shape: f32[1,128], index: 4, kind: input, shape index: {}]   ;;  %s888_s5 = inlined_call_operand.vmem [shape: f32[8,128], index: 5, kind: output, shape index: {}]  }
   0x1   :  { %s18_s19 = sshll.u32 %s747_s18, 4  ;;  %s19_s19 = int_to_ptr.vmem [resolvable:$true] %s18_s19 }
   0x2   :  { %s733_s20 = scalar_lea.vmem %s19_s19, 12544  ;;  %p738_p1 = scmp.lt.s32.totalorder %s19_s19, %s19_s19 }
   0x3   :  { %p734_p0 = scmp.ne.s32.totalorder %s19_s19, %s733_s20  ;;  %p739_p2 = scmp.lt.s32.totalorder %s733_s20, %s733_s20 }
   0x5   :  { %p740_p3 = por %p739_p2, %p738_p1 }
   0x7   :  { %p741_p4 = pnand %p740_p3, %p734_p0 }
   0x9   :  { %744 = shalt.err (!%p741_p4)
}
   0xa   :  { %s748_s21 = smov 128   ;;  %s749_s22 = smov 8  }
   0xb   :  { %24 = dma.hbm_to_vmem [thread:$0]  %s884_s1, 12544, %s19_s19, [#allocation3], %s748_s21, %s748_s21, %s749_s22  }
   0xc   :  { %745 = dma.done.wait [#allocation3], 12544  }
   0xd   :  { %746 = vsyncadd [#allocation3], 4294954752  ;;  %v72_v0 = vld [vmem:[#allocation2 + $0xf8] sm:$0xff]  ;;  %v71_v2 = vld [vmem:[#allocation2 + $0xf0] sm:$0xff]  ;;  %vm146_vm0 = vcmask 130048   ;;  %vm751_vm1 = vmmov 0  }
   0xe   :  { %v56_v1 = vld [vmem:[#allocation2 + $0x78] sm:$0xff]  ;;  %549 = vmatprep.subr.mxu0 %v72_v0  ;;  %v55_v4 = vld [vmem:[#allocation2 + $0x70] sm:$0xff]  ;;  %v70_v6 = vld [vmem:[#allocation2 + $0xe8] sm:$0xff] }
   0xf   :  { %v104_v3 = vld [vmem:[#allocation2 + $0x1f8] sm:$0xff]  ;;  %550 = vmatpush3.msra.mxu0 %v56_v1  ;;  %v103_v7 = vld [vmem:[#allocation2 + $0x1f0] sm:$0xff]  ;;  %v54_v8 = vld [vmem:[#allocation2 + $0x68] sm:$0xff] }
  0x10   :  { %v88_v5 = vld [vmem:[#allocation2 + $0x178] sm:$0xff]  ;;  %584 = vmatprep.subr.mxu1 %v104_v3  ;;  %551 = vmatprep.subr.mxu0 %v71_v2  ;;  %v87_v9 = vld [vmem:[#allocation2 + $0x170] sm:$0xff]  ;;  %v102_v10 = vld [vmem:[#allocation2 + $0x1e8] sm:$0xff] }
  0x11   :  { %585 = vmatpush3.msra.mxu1 %v88_v5  ;;  %552 = vmatpush3.msra.mxu0 %v55_v4  ;;  %v69_v11 = vld [vmem:[#allocation2 + $0xe0] sm:$0xff]  ;;  %v86_v12 = vld [vmem:[#allocation2 + $0x168] sm:$0xff]  ;;  %v68_v15 = vld [vmem:[#allocation2 + $0xd8] sm:$0xff] }
  0x12   :  { %586 = vmatprep.subr.mxu1 %v103_v7  ;;  %553 = vmatprep.subr.mxu0 %v70_v6  ;;  %v53_v13 = vld [vmem:[#allocation2 + $0x60] sm:$0xff]  ;;  %v52_v17 = vld [vmem:[#allocation2 + $0x58] sm:$0xff]  ;;  %v67_v19 = vld [vmem:[#allocation2 + $0xd0] sm:$0xff] }
  0x13   :  { %587 = vmatpush3.msra.mxu1 %v87_v9  ;;  %v101_v14 = vld [vmem:[#allocation2 + $0x1e0] sm:$0xff]  ;;  %554 = vmatpush3.msra.mxu0 %v54_v8  ;;  %v100_v18 = vld [vmem:[#allocation2 + $0x1d8] sm:$0xff]  ;;  %v51_v21 = vld [vmem:[#allocation2 + $0x50] sm:$0xff] }
  0x14   :  { %588 = vmatprep.subr.mxu1 %v102_v10  ;;  %v85_v16 = vld [vmem:[#allocation2 + $0x160] sm:$0xff]  ;;  %555 = vmatprep.subr.mxu0 %v69_v11  ;;  %v84_v20 = vld [vmem:[#allocation2 + $0x158] sm:$0xff]  ;;  %v99_v22 = vld [vmem:[#allocation2 + $0x1d0] sm:$0xff] }
  0x15   :  { %589 = vmatpush3.msra.mxu1 %v86_v12  ;;  %556 = vmatpush3.msra.mxu0 %v53_v13  ;;  %v66_v23 = vld [vmem:[#allocation2 + $0xc8] sm:$0xff]  ;;  %v83_v24 = vld [vmem:[#allocation2 + $0x150] sm:$0xff]  ;;  %v65_v27 = vld [vmem:[#allocation2 + $0xc0] sm:$0xff] }
  0x16   :  { %590 = vmatprep.subr.mxu1 %v101_v14  ;;  %557 = vmatprep.subr.mxu0 %v68_v15  ;;  %v50_v25 = vld [vmem:[#allocation2 + $0x48] sm:$0xff]  ;;  %v49_v29 = vld [vmem:[#allocation2 + $0x40] sm:$0xff]  ;;  %v64_v31 = vld [vmem:[#allocation2 + $0xb8] sm:$0xff]  ;;  %v750_v14 = vmov 0.0  }
  0x17   :  { %591 = vmatpush3.msra.mxu1 %v85_v16  ;;  %558 = vmatpush3.msra.mxu0 %v52_v17  ;;  %v98_v26 = vld [vmem:[#allocation2 + $0x1c8] sm:$0xff]  ;;  %v97_v30 = vld [vmem:[#allocation2 + $0x1c0] sm:$0xff]  ;;  %v48_v33 = vld [vmem:[#allocation2 + $0x38] sm:$0xff] }
  0x18   :  { %592 = vmatprep.subr.mxu1 %v100_v18  ;;  %559 = vmatprep.subr.mxu0 %v67_v19  ;;  %v82_v28 = vld [vmem:[#allocation2 + $0x148] sm:$0xff]  ;;  %v81_v32 = vld [vmem:[#allocation2 + $0x140] sm:$0xff]  ;;  %v96_v34 = vld [vmem:[#allocation2 + $0x1b8] sm:$0xff] }
  0x19   :  { %593 = vmatpush3.msra.mxu1 %v84_v20  ;;  %560 = vmatpush3.msra.mxu0 %v51_v21  ;;  %v63_v35 = vld [vmem:[#allocation2 + $0xb0] sm:$0xff]  ;;  %v80_v36 = vld [vmem:[#allocation2 + $0x138] sm:$0xff]  ;;  %v62_v39 = vld [vmem:[#allocation2 + $0xa8] sm:$0xff] }
  0x1a   :  { %594 = vmatprep.subr.mxu1 %v99_v22  ;;  %561 = vmatprep.subr.mxu0 %v66_v23  ;;  %v47_v37 = vld [vmem:[#allocation2 + $0x30] sm:$0xff]  ;;  %v46_v41 = vld [vmem:[#allocation2 + $0x28] sm:$0xff]  ;;  %v61_v43 = vld [vmem:[#allocation2 + $0xa0] sm:$0xff] }
  0x1b   :  { %595 = vmatpush3.msra.mxu1 %v83_v24  ;;  %562 = vmatpush3.msra.mxu0 %v50_v25  ;;  %v95_v38 = vld [vmem:[#allocation2 + $0x1b0] sm:$0xff]  ;;  %v94_v42 = vld [vmem:[#allocation2 + $0x1a8] sm:$0xff]  ;;  %v45_v45 = vld [vmem:[#allocation2 + $0x20] sm:$0xff] }
  0x1c   :  { %596 = vmatprep.subr.mxu1 %v98_v26  ;;  %563 = vmatprep.subr.mxu0 %v65_v27  ;;  %v79_v40 = vld [vmem:[#allocation2 + $0x130] sm:$0xff]  ;;  %v78_v44 = vld [vmem:[#allocation2 + $0x128] sm:$0xff]  ;;  %v93_v46 = vld [vmem:[#allocation2 + $0x1a0] sm:$0xff] }
  0x1d   :  { %597 = vmatpush3.msra.mxu1 %v82_v28  ;;  %564 = vmatpush3.msra.mxu0 %v49_v29  ;;  %v60_v47 = vld [vmem:[#allocation2 + $0x98] sm:$0xff]  ;;  %v77_v48 = vld [vmem:[#allocation2 + $0x120] sm:$0xff]  ;;  %v59_v51 = vld [vmem:[#allocation2 + $0x90] sm:$0xff] }
  0x1e   :  { %598 = vmatprep.subr.mxu1 %v97_v30  ;;  %565 = vmatprep.subr.mxu0 %v64_v31  ;;  %v44_v49 = vld [vmem:[#allocation2 + $0x18] sm:$0xff]  ;;  %v43_v53 = vld [vmem:[#allocation2 + $0x10] sm:$0xff]  ;;  %v58_v55 = vld [vmem:[#allocation2 + $0x88] sm:$0xff] }
  0x1f   :  { %599 = vmatpush3.msra.mxu1 %v81_v32  ;;  %566 = vmatpush3.msra.mxu0 %v48_v33  ;;  %v92_v50 = vld [vmem:[#allocation2 + $0x198] sm:$0xff]  ;;  %v91_v54 = vld [vmem:[#allocation2 + $0x190] sm:$0xff]  ;;  %v42_v57 = vld [vmem:[#allocation2 + $0x8] sm:$0xff] }
  0x20   :  { %600 = vmatprep.subr.mxu1 %v96_v34  ;;  %567 = vmatprep.subr.mxu0 %v63_v35  ;;  %v76_v52 = vld [vmem:[#allocation2 + $0x118] sm:$0xff]  ;;  %v75_v56 = vld [vmem:[#allocation2 + $0x110] sm:$0xff]  ;;  %v90_v58 = vld [vmem:[#allocation2 + $0x188] sm:$0xff] }
  0x21   :  { %601 = vmatpush3.msra.mxu1 %v80_v36  ;;  %568 = vmatpush3.msra.mxu0 %v47_v37  ;;  %v57_v59 = vld [vmem:[#allocation2 + $0x80] sm:$0xff]  ;;  %v35_v60 = vld [vmem:[%s883_s0 + $0x8] sm:$0xff]  ;;  %v136_v1 = vld [vmem:[#allocation2 + $0x2f8] sm:$0xff] }
  0x22   :  { %602 = vmatprep.subr.mxu1 %v95_v38  ;;  %569 = vmatprep.subr.mxu0 %v62_v39  ;;  %v41_v61 = vld [vmem:[#allocation2] sm:$0xff]  ;;  %v74_v62 = vld [vmem:[#allocation2 + $0x108] sm:$0xff]  ;;  %v37_v3 = vld [vmem:[%s883_s0 + $0x18] sm:$0xff] }
  0x23   :  { %603 = vmatpush3.msra.mxu1 %v79_v40  ;;  %570 = vmatpush3.msra.mxu0 %v46_v41  ;;  %v34_v63 = vld [vmem:[%s883_s0] sm:$0xff]  ;;  %v120_v4 = vld [vmem:[#allocation2 + $0x278] sm:$0xff]  ;;  %v36_v5 = vld [vmem:[%s883_s0 + $0x10] sm:$0xff] }
  0x24   :  { %604 = vmatprep.subr.mxu1 %v94_v42  ;;  %571 = vmatprep.subr.mxu0 %v61_v43  ;;  %v89_v0 = vld [vmem:[#allocation2 + $0x180] sm:$0xff]  ;;  %v135_v6 = vld [vmem:[#allocation2 + $0x2f0] sm:$0xff]  ;;  %v39_v8 = vld [vmem:[%s883_s0 + $0x28] sm:$0xff] }
  0x25   :  { %605 = vmatpush3.msra.mxu1 %v78_v44  ;;  %572 = vmatpush3.msra.mxu0 %v45_v45  ;;  %v73_v2 = vld [vmem:[#allocation2 + $0x100] sm:$0xff]  ;;  %v119_v7 = vld [vmem:[#allocation2 + $0x270] sm:$0xff]  ;;  %v134_v9 = vld [vmem:[#allocation2 + $0x2e8] sm:$0xff] }
  0x26   :  { %606 = vmatprep.subr.mxu1 %v93_v46  ;;  %573 = vmatprep.subr.mxu0 %v60_v47  ;;  %v118_v10 = vld [vmem:[#allocation2 + $0x268] sm:$0xff]  ;;  %v133_v12 = vld [vmem:[#allocation2 + $0x2e0] sm:$0xff]  ;;  %v132_v16 = vld [vmem:[#allocation2 + $0x2d8] sm:$0xff] }
  0x27   :  { %607 = vmatpush3.msra.mxu1 %v77_v48  ;;  %574 = vmatpush3.msra.mxu0 %v44_v49  ;;  %v138_v11 = vld [vmem:[#allocation2 + $0x308] sm:$0xff]  ;;  %v117_v13 = vld [vmem:[#allocation2 + $0x260] sm:$0xff]  ;;  %v116_v17 = vld [vmem:[#allocation2 + $0x258] sm:$0xff] }
  0x28   :  { %608 = vmatprep.subr.mxu1 %v92_v50  ;;  %575 = vmatprep.subr.mxu0 %v59_v51  ;;  %v137_v15 = vld [vmem:[#allocation2 + $0x300] sm:$0xff]  ;;  %v40_v18 = vld [vmem:[%s883_s0 + $0x30] sm:$0xff]  ;;  %v130_v21 = vld [vmem:[#allocation2 + $0x2c8] sm:$0xff] }
  0x29   :  { %609 = vmatpush3.msra.mxu1 %v76_v52  ;;  %576 = vmatpush3.msra.mxu0 %v43_v53  ;;  %v131_v19 = vld [vmem:[#allocation2 + $0x2d0] sm:$0xff]  ;;  %v114_v22 = vld [vmem:[#allocation2 + $0x248] sm:$0xff]  ;;  %v129_v23 = vld [vmem:[#allocation2 + $0x2c0] sm:$0xff] }
  0x2a   :  { %610 = vmatprep.subr.mxu1 %v91_v54  ;;  %577 = vmatprep.subr.mxu0 %v58_v55  ;;  %v115_v20 = vld [vmem:[#allocation2 + $0x250] sm:$0xff]  ;;  %v113_v24 = vld [vmem:[#allocation2 + $0x240] sm:$0xff]  ;;  %v128_v25 = vld [vmem:[#allocation2 + $0x2b8] sm:$0xff] }
  0x2b   :  { %611 = vmatpush3.msra.mxu1 %v75_v56  ;;  %578 = vmatpush3.msra.mxu0 %v42_v57  ;;  %v112_v26 = vld [vmem:[#allocation2 + $0x238] sm:$0xff]  ;;  %v127_v27 = vld [vmem:[#allocation2 + $0x2b0] sm:$0xff]  ;;  %v126_v29 = vld [vmem:[#allocation2 + $0x2a8] sm:$0xff] }
  0x2c   :  { %612 = vmatprep.subr.mxu1 %v90_v58  ;;  %579 = vmatprep.subr.mxu0 %v57_v59  ;;  %v111_v28 = vld [vmem:[#allocation2 + $0x230] sm:$0xff]  ;;  %v110_v30 = vld [vmem:[#allocation2 + $0x228] sm:$0xff]  ;;  %v125_v31 = vld [vmem:[#allocation2 + $0x2a0] sm:$0xff] }
  0x2d   :  { %214 = vmatprep.mubr.f32.mxu0 %v35_v60  ;;  %580 = vmatpush3.msra.mxu0 %v41_v61  ;;  %v109_v32 = vld [vmem:[#allocation2 + $0x220] sm:$0xff]  ;;  %v124_v33 = vld [vmem:[#allocation2 + $0x298] sm:$0xff]  ;;  %v123_v35 = vld [vmem:[#allocation2 + $0x290] sm:$0xff] }
  0x2e   :  { %613 = vmatpush3.msra.mxu1 %v74_v62  ;;  %215 = vmatmul.mubr.f32.vlgmr.msra.gmra.mxu0 %v34_v63  ;;  %v108_v34 = vld [vmem:[#allocation2 + $0x218] sm:$0xff]  ;;  %v107_v36 = vld [vmem:[#allocation2 + $0x210] sm:$0xff]  ;;  %v122_v37 = vld [vmem:[#allocation2 + $0x288] sm:$0xff] }
  0x2f   :  { %614 = vmatprep.subr.mxu1 %v89_v0  ;;  %619 = vmatprep.subr.mxu0 %v136_v1  ;;  %v106_v38 = vld [vmem:[#allocation2 + $0x208] sm:$0xff]  ;;  %v121_v39 = vld [vmem:[#allocation2 + $0x280] sm:$0xff]  ;;  %v448_v42 = vld [vmem:[%s886_s3 + $0x78] sm:$0xff] }
  0x30   :  { %615 = vmatpush3.msra.mxu1 %v73_v2  ;;  %284 = vmatprep.mubr.f32.mxu1 %v37_v3  ;;  %v105_v40 = vld [vmem:[#allocation2 + $0x200] sm:$0xff]  ;;  %v447_v43 = vld [vmem:[%s886_s3 + $0x70] sm:$0xff]  ;;  %v446_v44 = vld [vmem:[%s886_s3 + $0x68] sm:$0xff] }
  0x31   :  { %620 = vmatpush3.msra.mxu0 %v120_v4  ;;  %285 = vmatmul.mubr.f32.vlgmr.msra.gmra.mxu1 %v36_v5  ;;  %v38_v41 = vld [vmem:[%s883_s0 + $0x20] sm:$0xff]  ;;  %v444_v46 = vld [vmem:[%s886_s3 + $0x58] sm:$0xff]  ;;  %v443_v47 = vld [vmem:[%s886_s3 + $0x50] sm:$0xff] }
  0x32   :  { %621 = vmatprep.subr.mxu0 %v135_v6  ;;  %354 = vmatprep.mubr.f32.mxu0 %v39_v8  ;;  %v445_v45 = vld [vmem:[%s886_s3 + $0x60] sm:$0xff]  ;;  %v442_v48 = vld [vmem:[%s886_s3 + $0x48] sm:$0xff]  ;;  %v440_v50 = vld [vmem:[%s886_s3 + $0x38] sm:$0xff] }
  0x33   :  { %622 = vmatpush3.msra.mxu0 %v119_v7  ;;  %674 = vmatprep.subr.mxu1 %v750_v14  ;;  %v441_v49 = vld [vmem:[%s886_s3 + $0x40] sm:$0xff]  ;;  %v439_v51 = vld [vmem:[%s886_s3 + $0x30] sm:$0xff]  ;;  %v438_v52 = vld [vmem:[%s886_s3 + $0x28] sm:$0xff] }
  0x34   :  { %623 = vmatprep.subr.mxu0 %v134_v9  ;;  %675 = vmatpush3.msra.mxu1 %v138_v11  ;;  %v437_v53 = vld [vmem:[%s886_s3 + $0x20] sm:$0xff]  ;;  %v436_v54 = vld [vmem:[%s886_s3 + $0x18] sm:$0xff]  ;;  %v435_v55 = vld [vmem:[%s886_s3 + $0x10] sm:$0xff] }
  0x35   :  { %624 = vmatpush3.msra.mxu0 %v118_v10  ;;  %676 = vmatprep.subr.mxu1 %v750_v14  ;;  %v434_v56 = vld [vmem:[%s886_s3 + $0x8] sm:$0xff]  ;;  %v433_v57 = vld [vmem:[%s886_s3] sm:$0xff] }
  0x36   :  { %625 = vmatprep.subr.mxu0 %v133_v12  ;;  %677 = vmatpush3.msra.mxu1 %v137_v15  ;;  %v546_v1 = vld [vmem:[%s885_s2] ss:$0 sm:$0xff]  ;;  %v526_v12 = vlaneseq }
  0x37   :  { %626 = vmatpush3.msra.mxu0 %v117_v13  ;;  %678 = vmatprep.mubr.msk.f32.mxu1 %vm751_vm1, %v750_v14 }
  0x38   :  { %627 = vmatprep.subr.mxu0 %v132_v16  ;;  %679 = vmatmul.mubr.msk.f32.vlgmr.msra.gmra.mxu1 %vm146_vm0, %v40_v18  ;;  %v527_v13 = vand.u32 127, %v526_v12 }
  0x39   :  { %628 = vmatpush3.msra.mxu0 %v116_v17  ;;  %681 = vmatprep.subr.mxu1 %v750_v14 }
  0x3a   :  { %629 = vmatprep.subr.mxu0 %v131_v19  ;;  %713 = vmatprep.mubr.msk.f32.mxu1 %vm751_vm1, %v750_v14  ;;  %vm528_vm3 = vcmp.lt.s32.totalorder %v527_v13, 10 }
  0x3b   :  { %630 = vmatpush3.msra.mxu0 %v115_v20  ;;  %682 = vmatpush3.msra.mxu1 %v448_v42 }
  0x3c   :  { %631 = vmatprep.subr.mxu0 %v130_v21  ;;  %683 = vmatprep.subr.mxu1 %v750_v14 }
  0x3d   :  { %632 = vmatpush3.msra.mxu0 %v114_v22  ;;  %684 = vmatpush3.msra.mxu1 %v447_v43 }
  0x3e   :  { %633 = vmatprep.subr.mxu0 %v129_v23  ;;  %685 = vmatprep.subr.mxu1 %v750_v14 }
  0x3f   :  { %634 = vmatpush3.msra.mxu0 %v113_v24  ;;  %686 = vmatpush3.msra.mxu1 %v446_v44 }
  0x40   :  { %635 = vmatprep.subr.mxu0 %v128_v25  ;;  %687 = vmatprep.subr.mxu1 %v750_v14 }
  0x41   :  { %636 = vmatpush3.msra.mxu0 %v112_v26  ;;  %688 = vmatpush3.msra.mxu1 %v445_v45 }
  0x42   :  { %637 = vmatprep.subr.mxu0 %v127_v27  ;;  %689 = vmatprep.subr.mxu1 %v750_v14 }
  0x43   :  { %638 = vmatpush3.msra.mxu0 %v111_v28  ;;  %690 = vmatpush3.msra.mxu1 %v444_v46 }
  0x44   :  { %639 = vmatprep.subr.mxu0 %v126_v29  ;;  %691 = vmatprep.subr.mxu1 %v750_v14 }
  0x45   :  { %640 = vmatpush3.msra.mxu0 %v110_v30  ;;  %692 = vmatpush3.msra.mxu1 %v443_v47 }
  0x46   :  { %641 = vmatprep.subr.mxu0 %v125_v31  ;;  %693 = vmatprep.subr.mxu1 %v750_v14 }
  0x47   :  { %642 = vmatpush3.msra.mxu0 %v109_v32  ;;  %694 = vmatpush3.msra.mxu1 %v442_v48 }
  0x48   :  { %643 = vmatprep.subr.mxu0 %v124_v33  ;;  %695 = vmatprep.subr.mxu1 %v750_v14 }
  0x49   :  { %644 = vmatpush3.msra.mxu0 %v108_v34  ;;  %696 = vmatpush3.msra.mxu1 %v441_v49 }
  0x4a   :  { %645 = vmatprep.subr.mxu0 %v123_v35  ;;  %697 = vmatprep.subr.mxu1 %v750_v14 }
  0x4b   :  { %646 = vmatpush3.msra.mxu0 %v107_v36  ;;  %698 = vmatpush3.msra.mxu1 %v440_v50 }
  0x4c   :  { %647 = vmatprep.subr.mxu0 %v122_v37  ;;  %699 = vmatprep.subr.mxu1 %v750_v14 }
  0x4d   :  { %648 = vmatpush3.msra.mxu0 %v106_v38  ;;  %700 = vmatpush3.msra.mxu1 %v439_v51 }
  0x4e   :  { %649 = vmatprep.subr.mxu0 %v121_v39  ;;  %701 = vmatprep.subr.mxu1 %v750_v14 }
  0x4f   :  { %650 = vmatpush3.msra.mxu0 %v105_v40  ;;  %702 = vmatpush3.msra.mxu1 %v438_v52 }
  0x50   :  { %355 = vmatmul.mubr.f32.vlgmr.msra.gmra.mxu0 %v38_v41  ;;  %703 = vmatprep.subr.mxu1 %v750_v14 }
  0x51   :  { %704 = vmatpush3.msra.mxu1 %v437_v53 }
  0x52   :  { %705 = vmatprep.subr.mxu1 %v750_v14 }
  0x53   :  { %706 = vmatpush3.msra.mxu1 %v436_v54 }
  0x54   :  { %707 = vmatprep.subr.mxu1 %v750_v14 }
  0x55   :  { %708 = vmatpush3.msra.mxu1 %v435_v55 }
  0x56   :  { %709 = vmatprep.subr.mxu1 %v750_v14 }
  0x57   :  { %710 = vmatpush3.msra.mxu1 %v434_v56 }
  0x58   :  { %711 = vmatprep.subr.mxu1 %v750_v14  ;;  %v548_v14 = vld [vmem:[%s887_s4] ss:$0 sm:$0xff] }
  0x59   :  { %712 = vmatpush3.msra.mxu1 %v433_v57 }
  0xee   :  { %v581_v62 = vpop.f32.mrf.mxu0 }
  0xf0   :  { %v582_v63 = vpop.f32.mrf.mxu0 }
  0xf1   :  { %v616_v58 = vpop.f32.mrf.mxu1  ;;  %v583_v0 = vadd.f32 %v582_v63, %v581_v62 }
  0xf3   :  { %v617_v59 = vpop.f32.mrf.mxu1  ;;  %v217_v2 = vadd.f32 %v583_v0, %v546_v1 }
  0xf4   :  { %v618_v3 = vadd.f32 %v617_v59, %v616_v58 }
  0xf6   :  { %v287_v6 = vadd.f32 %v618_v3, %v217_v2 }
  0xf8   :  { %v426_v60 = vpop.f32.mrf.mxu1 }
  0xfa   :  { %v680_v61 = vpop.f32.mrf.mxu1 }
 0x110   :  { %v651_v4 = vpop.f32.mrf.mxu0 }
 0x112   :  { %v652_v5 = vpop.f32.mrf.mxu0 }
 0x113   :  { %v653_v7 = vadd.f32 %v652_v5, %v651_v4 }
 0x115   :  { %v357_v8 = vadd.f32 %v653_v7, %v287_v6 }
 0x117   :  { %v427_v9 = vadd.f32 %v426_v60, %v357_v8 }
 0x119   :  { %vm430_vm2 = vcmp.gt.f32.partialorder %v427_v9, 0.0  ;;  %v431_v10 = vmul.f32 0.1, %v427_v9 }
 0x11b   :  { %v432_v11 = vsel %vm430_vm2, %v427_v9, %v431_v10 }
 0x11c   :  { %714 = vmatmul.mubr.f32.vlgmr.msra.gmra.mxu1 %v432_v11 }
 0x1dc   :  { %v522_v15 = vpop.f32.mrf.mxu1 }
 0x1dd   :  { %v523_v16 = vadd.f32 %v548_v14, %v522_v15 }
 0x1de   :  { %v715_v17 = vpop.f32.mrf.mxu1 }
 0x1df   :  { %v529_v18 = vsel %vm528_vm3, %v523_v16, -1e+30 }
 0x1e0   :  { %530 = vmax.xlane.f32.xlu0 %v529_v18 }
 0x269   :  { %v531_v19 = vpop.xlane.xlu0 %530 }
 0x26a   :  { %v532_v20 = vsub.f32 %v529_v18, %v531_v19 }
 0x26c   :  { %v533_v21 = vmul.f32 1.442695, %v532_v20 }
 0x26e   :  { %721 = vpow2.f32 %v533_v21 }
 0x27b   :  { %v722_v22 = vpop.eup %721 }
 0x27c   :  { %535 = vadd.xlane.f32.xlu0 %v722_v22 }
 0x305   :  { %v536_v23 = vpop.xlane.xlu0 %535 }
 0x306   :  { %723 = vlog2.f32 %v536_v23 }
 0x313   :  { %v724_v24 = vpop.eup %723 }
 0x314   :  { %v538_v25 = vmul.f32 0.6931472, %v724_v24 }
 0x316   :  { %v539_v26 = vsub.f32 %v532_v20, %v538_v25 }
 0x318   :  { %540 = vst [vmem:[%s888_s5] sm:$0xff] %v539_v26 }
 0x319   :  { %545 = vsyncpa [#allocation3], 1 }

</bundles_post_ra>
